<compile_context>
chip_gen: v7x
topology: tpu7x:2x2x1
jax: 0.10.0
libtpu: 0.0.40
codegen_flags: <defaults>
</compile_context>

<pallas_src>
import numpy as np
import jax
import jax.numpy as jnp
from jax import lax
from jax.experimental import pallas as pl
from jax.experimental.pallas import tpu as pltpu


# ----------------------------- parameter setup (plain JAX glue) ----------------
def spectral_normalize(w, u, bound=False):
    """JAX port of SpectralNorm.compute_weight (one power-iteration step)."""
    w_mat = w.reshape(w.shape[0], -1)
    v = w_mat.T @ u
    v = v / jnp.linalg.norm(v)
    u2 = w_mat @ v
    u2 = u2 / jnp.linalg.norm(u2)
    sigma = u2 @ w_mat @ v
    if bound:
        return w / (sigma + 1e-6) * jnp.minimum(sigma, 1.0)
    return w / sigma


def _leaky(x, slope=0.2):
    return jnp.where(x > 0, x, slope * x)


def _conv_indicator(W):
    """ind[v, w, dx] = 1 iff input column v feeds output column w via tap dx."""
    ind = np.zeros((W, W, 3), np.float32)
    for w in range(W):
        for dx in range(3):
            v = w + dx - 1
            if 0 <= v < W:
                ind[v, w, dx] = 1.0
    return jnp.asarray(ind)


def _toeplitz_3x3_stacked(w_oihw, W):
    """(Cout, Cin, 3, 3) OIHW -> (3*W*Cin, W*Cout) K-stacked block-Toeplitz matrix.

    Row blocks are ordered [dy=0 (y-1), dy=1 (y), dy=2 (y+1)], matching the
    lane-concatenation order [x(y-1) | x(y) | x(y+1)] used inside the kernel.
    """
    Cout, Cin = w_oihw.shape[0], w_oihw.shape[1]
    w_t = jnp.transpose(w_oihw, (2, 3, 1, 0)).astype(jnp.float32)   # (dy, dx, Cin, Cout)
    ind = _conv_indicator(W)
    mats = [jnp.einsum('vwx,xio->viwo', ind, w_t[dy]).reshape(W * Cin, W * Cout)
            for dy in range(3)]
    return jnp.concatenate(mats, axis=0)                            # (3*W*Cin, W*Cout)


def _toeplitz_1x1(w_oihw, W):
    """(Cout, Cin, 1, 1) OIHW -> (W*Cin, W*Cout) block-diagonal matrix."""
    w_io = jnp.transpose(w_oihw[:, :, 0, 0]).astype(jnp.float32)    # (Cin, Cout)
    return jnp.einsum('vw,io->viwo', jnp.eye(W, dtype=jnp.float32),
                      w_io).reshape(W * w_io.shape[0], W * w_io.shape[1])


def prepare_packed_params(params, W):
    """Build the fused, lane-packed weight matrices consumed by the kernel."""
    w1, b1, w2, b2, wskip = params
    Cin, Cmid, Cout = w1.shape[1], w1.shape[0], w2.shape[0]

    t1s = _toeplitz_3x3_stacked(w1, W)                    # (3*W*Cin,  W*Cmid)
    t2s = _toeplitz_3x3_stacked(w2, W)                    # (3*W*Cmid, W*Cout)

    if wskip is not None:
        tskip = _toeplitz_1x1(wskip, W)                   # (W*Cin, W*Cout)
    else:                                                 # identity skip (Cin == Cout)
        tskip = jnp.eye(W * Cin, dtype=jnp.float32)

    zeros = jnp.zeros((W * Cin, W * Cout), jnp.float32)
    skip_stacked = jnp.concatenate([zeros, tskip, zeros], axis=0)   # centre-K only
    w1f = jnp.concatenate([t1s, skip_stacked], axis=1)    # (3*W*Cin, W*(Cmid+Cout))

    b1r = jnp.tile(b1.astype(jnp.float32), W).reshape(1, W * Cmid)
    b2r = jnp.tile(b2.astype(jnp.float32), W).reshape(1, W * Cout)
    return w1f, b1r, t2s, b2r


# ----------------------------- Pallas kernel -----------------------------------
def make_resblock_kernel(H, final_act=True):
    def kernel(x_ref, w1f_ref, b1_ref, w2f_ref, b2_ref, o_ref):
        x = x_ref[...]                               # (M, W*Cin) lane-packed
        M = x.shape[0]
        WCmid = b1_ref.shape[1]

        # Per-image height-boundary masks, computed once and reused by both convs.
        y = lax.broadcasted_iota(jnp.int32, (M, 1), 0) % H
        keep_up = (y != 0).astype(x.dtype)           # rows where a[r-1] is valid
        keep_dn = (y != (H - 1)).astype(x.dtype)     # rows where a[r+1] is valid

        def cat3(a):
            # [a(y-1) | a(y) | a(y+1)] along lanes; XLU sublane rolls + mask.
            up = pltpu.roll(a, 1, 0) * keep_up       # row r sees a[r-1]
            dn = pltpu.roll(a, M - 1, 0) * keep_dn   # row r sees a[r+1]
            return jnp.concatenate([up, a, dn], axis=1)

        # ---- conv1 (3x3, pad=1) + 1x1 skip fused into one MXU matmul ----
        r1 = jnp.dot(cat3(x), w1f_ref[...], preferred_element_type=jnp.float32)
        pre1 = r1[:, :WCmid]                          # conv1 pre-activation
        skip = r1[:, WCmid:]                          # 1x1 skip branch
        h1 = _leaky(pre1 + b1_ref[...])               # (M, W*Cmid)

        # ---- conv2 (3x3, pad=1) as one K-stacked Toeplitz matmul ----
        out = jnp.dot(cat3(h1), w2f_ref[...], preferred_element_type=jnp.float32)
        out = out + b2_ref[...] + skip                # (M, W*Cout)

        if final_act:
            out = _leaky(out)
        o_ref[...] = out.astype(o_ref.dtype)          # lane-dense unmasked store

    return kernel


# ----------------------------- wrappers -----------------------------------------
def resblock_forward_packed(x2d, packed_params, *, N, H, W, Cout, final_act=True):
    """Lane-packed entry point: x2d is (N*H, W*Cin); returns (N*H, W*Cout).

    Chain ResBlocks through this function to avoid NCHW transpose round trips.
    """
    w1f, b1r, w2f, b2r = packed_params
    Cin = x2d.shape[1] // W

    # Whole images per tile; aim for M ~ 256 rows, weights stay VMEM-resident.
    imgs = max(1, min(N, 256 // H if H <= 256 else 1))
    while N % imgs:
        imgs -= 1
    tile_m = imgs * H
    grid = (N // imgs,)

    kernel = make_resblock_kernel(H, final_act)
    return pl.pallas_call(
        kernel,
        out_shape=jax.ShapeDtypeStruct((N * H, W * Cout), jnp.float32),
        grid_spec=pltpu.PrefetchScalarGridSpec(
            num_scalar_prefetch=0,
            grid=grid,
            in_specs=[
                pl.BlockSpec((tile_m, W * Cin), lambda i: (i, 0)),
                pl.BlockSpec(w1f.shape, lambda i: (0, 0)),   # weights: constant map
                pl.BlockSpec(b1r.shape, lambda i: (0, 0)),
                pl.BlockSpec(w2f.shape, lambda i: (0, 0)),
                pl.BlockSpec(b2r.shape, lambda i: (0, 0)),
            ],
            out_specs=pl.BlockSpec((tile_m, W * Cout), lambda i: (i, 0)),
        ),
        compiler_params=pltpu.CompilerParams(
            dimension_semantics=("parallel",)),   # v7x: shard batch over 2 TCs
    )(x2d, w1f, b1r, w2f, b2r)


def pack_nchw(x_nchw):
    N, C, H, W = x_nchw.shape
    return jnp.transpose(x_nchw, (0, 2, 3, 1)).astype(jnp.float32).reshape(N * H, W * C)


def unpack_to_nchw(x2d, N, H, W, C):
    return jnp.transpose(x2d.reshape(N, H, W, C), (0, 3, 1, 2))


def resblock_forward(x_nchw, params, downsample=False):
    """NCHW module-boundary wrapper. x_nchw: (N, Cin, H, W) float32."""
    N, Cin, H, W = x_nchw.shape
    Cout = params[2].shape[0]

    packed = prepare_packed_params(params, W)
    x2d = pack_nchw(x_nchw)
    out2d = resblock_forward_packed(x2d, packed, N=N, H=H, W=W, Cout=Cout,
                                    final_act=not downsample)
    out = unpack_to_nchw(out2d, N, H, W, Cout)

    if downsample:
        # TODO(synk): fold the 2x2 avg-pool into the kernel as a Toeplitz pooling
        # matmul + sublane pair-add instead of this wrapper-side pool.
        out = lax.reduce_window(out, 0.0, lax.add, (1, 1, 2, 2), (1, 1, 2, 2),
                                'VALID') * 0.25
        out = _leaky(out)
    return out


# ----------------------------- pure-JAX reference (for verification) -----------
def resblock_reference(x, params, downsample=False):
    w1, b1, w2, b2, wskip = params
    dn = ('NCHW', 'OIHW', 'NCHW')
    out = lax.conv_general_dilated(x, w1, (1, 1), ((1, 1), (1, 1)),
                                   dimension_numbers=dn) + b1[None, :, None, None]
    out = jnp.where(out > 0, out, 0.2 * out)
    out = lax.conv_general_dilated(out, w2, (1, 1), ((1, 1), (1, 1)),
                                   dimension_numbers=dn) + b2[None, :, None, None]
    if wskip is not None:
        skip = lax.conv_general_dilated(x, wskip, (1, 1), ((0, 0), (0, 0)),
                                        dimension_numbers=dn)
    else:
        skip = x
    out = out + skip
    if downsample:
        out = lax.reduce_window(out, 0.0, lax.add, (1, 1, 2, 2), (1, 1, 2, 2),
                                'VALID') * 0.25
    return jnp.where(out > 0, out, 0.2 * out)


if __name__ == "__main__":
    key = jax.random.PRNGKey(0)
    N, Cin, Cout, H, W = 2, 4, 8, 16, 16
    downsample = False  # ResBlock(in_channel=4, out_channel=8, n_class=None, downsample=False)

    k_x, k_w1, k_u1, k_w2, k_u2, k_ws, k_us = jax.random.split(key, 7)
    x = jax.random.normal(k_x, (N, Cin, H, W), jnp.float32)

    # conv1 = spectral_n(Conv2d(Cin, Cout, 3, padding=1, bias=True))  (std=1)
    w1_orig = jax.random.normal(k_w1, (Cout, Cin, 3, 3), jnp.float32)
    u1 = jax.random.normal(k_u1, (Cout,), jnp.float32)
    w1 = spectral_normalize(w1_orig, u1, bound=False)
    b1 = jnp.zeros((Cout,), jnp.float32)           # spectral_n zeroes the bias

    # conv2 = spectral_n(Conv2d(Cout, Cout, 3, padding=1, bias=True), std=1e-10, bound=True)
    w2_orig = 1e-10 * jax.random.normal(k_w2, (Cout, Cout, 3, 3), jnp.float32)
    u2 = jax.random.normal(k_u2, (Cout,), jnp.float32)
    w2 = spectral_normalize(w2_orig, u2, bound=True)
    b2 = jnp.zeros((Cout,), jnp.float32)

    # skip = Sequential(spectral_n(Conv2d(Cin, Cout, 1, bias=False)))  (in != out)
    ws_orig = jax.random.normal(k_ws, (Cout, Cin, 1, 1), jnp.float32)
    us = jax.random.normal(k_us, (Cout,), jnp.float32)
    wskip = spectral_normalize(ws_orig, us, bound=False)

    # --- secondary check with O(1) conv2 weights so conv2's Toeplitz/shift path
    #     is actually exercised (the faithful 1e-10 init is below test atol) ---
    w2_chk = spectral_normalize(jax.random.normal(k_w2, (Cout, Cout, 3, 3),
                                                  jnp.float32), u2, bound=True)
    params_chk = (w1, b1, w2_chk, b2, wskip)
    out_chk = jax.block_until_ready(resblock_forward(x, params_chk, downsample))
    ref_chk = resblock_reference(x, params_chk, downsample)
    np.testing.assert_allclose(np.asarray(out_chk), np.asarray(ref_chk),
                               rtol=5e-4, atol=1e-4)

    # --- module-faithful configuration ---
    params = (w1, b1, w2, b2, wskip)
    out = jax.block_until_ready(resblock_forward(x, params, downsample))
    ref = resblock_reference(x, params, downsample)
    np.testing.assert_allclose(np.asarray(out), np.asarray(ref),
                               rtol=2e-4, atol=2e-5)

    print("KERNEL_OK")
</pallas_src>

<mosaic_0001>
module attributes {stable_mosaic.version = 11 : i64} {
  func.func @kernel(%arg0: i32, %arg1: memref<32x64xf32, #tpu.memory_space<vmem>>, %arg2: memref<192x256xf32, #tpu.memory_space<vmem>>, %arg3: memref<1x128xf32, #tpu.memory_space<vmem>>, %arg4: memref<384x128xf32, #tpu.memory_space<vmem>>, %arg5: memref<1x128xf32, #tpu.memory_space<vmem>>, %arg6: memref<32x128xf32, #tpu.memory_space<vmem>>) attributes {dimension_semantics = [#tpu.dimension_semantics<parallel>], iteration_bounds = array<i64: 1>, scalar_prefetch = 0 : i64, scratch_operands = 0 : i64, tpu.core_type = #tpu.core_type<tc>, window_params = [{transform_indices = @transform_0, window_bounds = array<i64: 32, 64>}, {pipeline_mode = #tpu.pipeline_mode<synchronous>, transform_indices = @transform_1, window_bounds = array<i64: 192, 256>}, {pipeline_mode = #tpu.pipeline_mode<synchronous>, transform_indices = @transform_2, window_bounds = array<i64: 1, 128>}, {pipeline_mode = #tpu.pipeline_mode<synchronous>, transform_indices = @transform_3, window_bounds = array<i64: 384, 128>}, {pipeline_mode = #tpu.pipeline_mode<synchronous>, transform_indices = @transform_4, window_bounds = array<i64: 1, 128>}, {transform_indices = @transform_5, window_bounds = array<i64: 32, 128>}]} {
    %c0 = arith.constant 0 : index
    %c0_0 = arith.constant 0 : index
    %0 = vector.load %arg1[%c0, %c0_0] : memref<32x64xf32, #tpu.memory_space<vmem>>, vector<32x64xf32>
    %1 = tpu.iota {dimensions = array<i32: 0>} : vector<32x1xi32>
    %c16_i32 = arith.constant 16 : i32
    %c0_i32 = arith.constant 0 : i32
    %2 = arith.cmpi eq, %c16_i32, %c0_i32 : i32
    %c1_i32 = arith.constant 1 : i32
    %3 = arith.select %2, %c1_i32, %c16_i32 : i32
    %4 = vector.broadcast %3 : i32 to vector<32x1xi32>
    %5 = arith.remsi %1, %4 : vector<32x1xi32>
    %c0_i32_1 = arith.constant 0 : i32
    %6 = vector.broadcast %c0_i32_1 : i32 to vector<32x1xi32>
    %7 = arith.cmpi ne, %5, %6 : vector<32x1xi32>
    %c0_i32_2 = arith.constant 0 : i32
    %8 = vector.broadcast %c0_i32_2 : i32 to vector<32x1xi32>
    %9 = arith.cmpi slt, %5, %8 : vector<32x1xi32>
    %c0_i32_3 = arith.constant 0 : i32
    %10 = arith.cmpi slt, %3, %c0_i32_3 : i32
    %11 = vector.broadcast %10 : i1 to vector<32x1xi1>
    %12 = vector.broadcast %11 : vector<32x1xi1> to vector<32x1xi1>
    %13 = arith.xori %9, %12 : vector<32x1xi1>
    %14 = arith.andi %13, %7 : vector<32x1xi1>
    %15 = vector.broadcast %3 : i32 to vector<32x1xi32>
    %16 = arith.addi %5, %15 : vector<32x1xi32>
    %17 = arith.select %14, %16, %5 : vector<32x1xi1>, vector<32x1xi32>
    %c0_i32_4 = arith.constant 0 : i32
    %18 = vector.broadcast %c0_i32_4 : i32 to vector<32x1xi32>
    %19 = arith.cmpi ne, %17, %18 : vector<32x1xi32>
    %20 = arith.extui %19 : vector<32x1xi1> to vector<32x1xi32>
    %21 = arith.sitofp %20 : vector<32x1xi32> to vector<32x1xf32>
    %c15_i32 = arith.constant 15 : i32
    %22 = vector.broadcast %c15_i32 : i32 to vector<32x1xi32>
    %23 = arith.cmpi ne, %17, %22 : vector<32x1xi32>
    %24 = arith.extui %23 : vector<32x1xi1> to vector<32x1xi32>
    %25 = arith.sitofp %24 : vector<32x1xi32> to vector<32x1xf32>
    %c1_i32_5 = arith.constant 1 : i32
    %26 = tpu.dynamic_rotate %0 by %c1_i32_5 dim 0 : vector<32x64xf32>, i32 -> vector<32x64xf32>
    %27 = vector.broadcast %21 : vector<32x1xf32> to vector<32x64xf32>
    %28 = arith.mulf %26, %27 : vector<32x64xf32>
    %c31_i32 = arith.constant 31 : i32
    %29 = tpu.dynamic_rotate %0 by %c31_i32 dim 0 : vector<32x64xf32>, i32 -> vector<32x64xf32>
    %30 = vector.broadcast %25 : vector<32x1xf32> to vector<32x64xf32>
    %31 = arith.mulf %29, %30 : vector<32x64xf32>
    %32 = tpu.concatenate %28, %0, %31 in 1 : vector<32x64xf32>, vector<32x64xf32>, vector<32x64xf32> -> vector<32x192xf32>
    %c0_6 = arith.constant 0 : index
    %c0_7 = arith.constant 0 : index
    %33 = vector.load %arg2[%c0_6, %c0_7] : memref<192x256xf32, #tpu.memory_space<vmem>>, vector<192x256xf32>
    %cst = arith.constant dense<0.000000e+00> : vector<32x256xf32>
    %34 = tpu.matmul %32, %33, %cst {dimension_numbers = #tpu.dot_dimension_numbers<[1], [0], [0], [1], [0, 0, 1, 1], [], []>} : vector<32x192xf32>, vector<192x256xf32>, vector<32x256xf32> -> vector<32x256xf32>
    %35 = vector.extract_strided_slice %34 {offsets = [0, 0], sizes = [32, 128], strides = [1, 1]} : vector<32x256xf32> to vector<32x128xf32>
    %36 = vector.extract_strided_slice %34 {offsets = [0, 128], sizes = [32, 128], strides = [1, 1]} : vector<32x256xf32> to vector<32x128xf32>
    %c0_8 = arith.constant 0 : index
    %c0_9 = arith.constant 0 : index
    %37 = vector.load %arg3[%c0_8, %c0_9] : memref<1x128xf32, #tpu.memory_space<vmem>>, vector<1x128xf32>
    %38 = vector.broadcast %37 : vector<1x128xf32> to vector<32x128xf32>
    %39 = arith.addf %35, %38 : vector<32x128xf32>
    %cst_10 = arith.constant 0.000000e+00 : f32
    %40 = vector.broadcast %cst_10 : f32 to vector<32x128xf32>
    %41 = arith.cmpf ogt, %39, %40 : vector<32x128xf32>
    %cst_11 = arith.constant 2.000000e-01 : f32
    %42 = vector.broadcast %cst_11 : f32 to vector<32x128xf32>
    %43 = arith.mulf %42, %39 : vector<32x128xf32>
    %44 = arith.select %41, %39, %43 : vector<32x128xi1>, vector<32x128xf32>
    %c1_i32_12 = arith.constant 1 : i32
    %45 = tpu.dynamic_rotate %44 by %c1_i32_12 dim 0 : vector<32x128xf32>, i32 -> vector<32x128xf32>
    %46 = vector.broadcast %21 : vector<32x1xf32> to vector<32x128xf32>
    %47 = arith.mulf %45, %46 : vector<32x128xf32>
    %c31_i32_13 = arith.constant 31 : i32
    %48 = tpu.dynamic_rotate %44 by %c31_i32_13 dim 0 : vector<32x128xf32>, i32 -> vector<32x128xf32>
    %49 = vector.broadcast %25 : vector<32x1xf32> to vector<32x128xf32>
    %50 = arith.mulf %48, %49 : vector<32x128xf32>
    %51 = tpu.concatenate %47, %44, %50 in 1 : vector<32x128xf32>, vector<32x128xf32>, vector<32x128xf32> -> vector<32x384xf32>
    %c0_14 = arith.constant 0 : index
    %c0_15 = arith.constant 0 : index
    %52 = vector.load %arg4[%c0_14, %c0_15] : memref<384x128xf32, #tpu.memory_space<vmem>>, vector<384x128xf32>
    %cst_16 = arith.constant dense<0.000000e+00> : vector<32x128xf32>
    %53 = tpu.matmul %51, %52, %cst_16 {dimension_numbers = #tpu.dot_dimension_numbers<[1], [0], [0], [1], [0, 0, 1, 1], [], []>} : vector<32x384xf32>, vector<384x128xf32>, vector<32x128xf32> -> vector<32x128xf32>
    %c0_17 = arith.constant 0 : index
    %c0_18 = arith.constant 0 : index
    %54 = vector.load %arg5[%c0_17, %c0_18] : memref<1x128xf32, #tpu.memory_space<vmem>>, vector<1x128xf32>
    %55 = vector.broadcast %54 : vector<1x128xf32> to vector<32x128xf32>
    %56 = arith.addf %53, %55 : vector<32x128xf32>
    %57 = arith.addf %56, %36 : vector<32x128xf32>
    %cst_19 = arith.constant 0.000000e+00 : f32
    %58 = vector.broadcast %cst_19 : f32 to vector<32x128xf32>
    %59 = arith.cmpf ogt, %57, %58 : vector<32x128xf32>
    %cst_20 = arith.constant 2.000000e-01 : f32
    %60 = vector.broadcast %cst_20 : f32 to vector<32x128xf32>
    %61 = arith.mulf %60, %57 : vector<32x128xf32>
    %62 = arith.select %59, %57, %61 : vector<32x128xi1>, vector<32x128xf32>
    %c0_21 = arith.constant 0 : index
    %c0_22 = arith.constant 0 : index
    %63 = vector.load %arg6[%c0_21, %c0_22] : memref<32x128xf32, #tpu.memory_space<vmem>>, vector<32x128xf32>
    tpu.vector_store %arg6[%c0_21, %c0_22], %62 {strides = array<i32>} : memref<32x128xf32, #tpu.memory_space<vmem>>, vector<32x128xf32>,
    return
  }
  func.func @transform_0(%arg0: i32) -> (i32, i32) {
    %c0_i32 = arith.constant 0 : i32
    %c0_i32_0 = arith.constant 0 : i32
    return %arg0, %c0_i32 : i32, i32
  }
  func.func @transform_1(%arg0: i32) -> (i32, i32) {
    %c0_i32 = arith.constant 0 : i32
    %c0_i32_0 = arith.constant 0 : i32
    %c0_i32_1 = arith.constant 0 : i32
    return %c0_i32, %c0_i32_0 : i32, i32
  }
  func.func @transform_2(%arg0: i32) -> (i32, i32) {
    %c0_i32 = arith.constant 0 : i32
    %c0_i32_0 = arith.constant 0 : i32
    %c0_i32_1 = arith.constant 0 : i32
    return %c0_i32, %c0_i32_0 : i32, i32
  }
  func.func @transform_3(%arg0: i32) -> (i32, i32) {
    %c0_i32 = arith.constant 0 : i32
    %c0_i32_0 = arith.constant 0 : i32
    %c0_i32_1 = arith.constant 0 : i32
    return %c0_i32, %c0_i32_0 : i32, i32
  }
  func.func @transform_4(%arg0: i32) -> (i32, i32) {
    %c0_i32 = arith.constant 0 : i32
    %c0_i32_0 = arith.constant 0 : i32
    %c0_i32_1 = arith.constant 0 : i32
    return %c0_i32, %c0_i32_0 : i32, i32
  }
  func.func @transform_5(%arg0: i32) -> (i32, i32) {
    %c0_i32 = arith.constant 0 : i32
    %c0_i32_0 = arith.constant 0 : i32
    return %arg0, %c0_i32 : i32, i32
  }
}

</mosaic_0001>

<bundles_post_ra>
// kernel: tpu_custom_call.1
= control target key start
LH: loop header
LB: loop body
LE: loop exit
PB: predicated region body
PF: predicated region fallthrough
CT: control target
= control target key end

     0   :  { %10 = vsyncpa [#allocation3], 0  ;;  %s1177_s0 = inlined_call_operand.hbm [shape: f32[32,64], index: 0, kind: input, shape index: {}]   ;;  %s1178_s1 = inlined_call_operand.hbm [shape: f32[192,256], index: 1, kind: input, shape index: {}]   ;;  %s1179_s2 = inlined_call_operand.vmem [shape: f32[1,128], index: 2, kind: input, shape index: {}]   ;;  %s1180_s3 = inlined_call_operand.hbm [shape: f32[384,128], index: 3, kind: input, shape index: {}]   ;;  %s1181_s4 = inlined_call_operand.vmem [shape: f32[1,128], index: 4, kind: input, shape index: {}]   ;;  %s1182_s5 = inlined_call_operand.hbm [shape: f32[32,128], index: 5, kind: output, shape index: {}]  }
   0x1   :  { %11 = vsyncpa [#allocation6], 0 }
   0x2   :  { %12 = vsyncpa [#allocation4], 0  ;;  %s977_s18 = smov [#allocation5]   ;;  %s883_s22 = scalar_lea.hbm %s1178_s1, 6144 }
   0x3   :  { %s30_s19 = sshll.u32 %s977_s18, 4  ;;  %p884_p0 = scmp.ne.s32.totalorder %s1178_s1, %s883_s22  ;;  %s31_s19 = int_to_ptr.vmem [resolvable:$true] %s30_s19 }
   0x4   :  { %p887_p1 = scmp.lt.u32.totalorder %s883_s22, %s1178_s1 }
   0x6   :  { %p889_p2 = pnand %p887_p1, %p884_p0 }
   0x8   :  { %892 = shalt.err (!%p889_p2)
}
   0x9   :  { %s893_s27 = scalar_lea.vmem %s31_s19, 6144  ;;  %p898_p4 = scmp.lt.s32.totalorder %s31_s19, %s31_s19 }
   0xa   :  { %p894_p3 = scmp.ne.s32.totalorder %s31_s19, %s893_s27  ;;  %p899_p5 = scmp.lt.s32.totalorder %s893_s27, %s893_s27 }
   0xc   :  { %p900_p6 = por %p899_p5, %p898_p4 }
   0xe   :  { %p901_p7 = pnand %p900_p6, %p894_p3 }
  0x10   :  { %904 = shalt.err (!%p901_p7)
}
  0x11   :  { %s978_s28 = smov 256   ;;  %s979_s29 = smov 16  }
  0x12   :  { %36 = dma.hbm_to_vmem [thread:$0]  %s1178_s1, 6144, %s31_s19, [#allocation6], %s978_s28, %s978_s28, %s979_s29  }
  0x13   :  { %s980_s7 = smov [#allocation2]   ;;  %s905_s11 = scalar_lea.hbm %s1177_s0, 512 }
  0x14   :  { %s18_s8 = sshll.u32 %s980_s7, 4  ;;  %p906_p8 = scmp.ne.s32.totalorder %s1177_s0, %s905_s11  ;;  %s19_s8 = int_to_ptr.vmem [resolvable:$true] %s18_s8 }
  0x15   :  { %p909_p9 = scmp.lt.u32.totalorder %s905_s11, %s1177_s0 }
  0x17   :  { %p911_p10 = pnand %p909_p9, %p906_p8 }
  0x19   :  { %914 = shalt.err (!%p911_p10)
}
  0x1a   :  { %s915_s16 = scalar_lea.vmem %s19_s8, 512  ;;  %p920_p12 = scmp.lt.s32.totalorder %s19_s8, %s19_s8 }
  0x1b   :  { %p916_p11 = scmp.ne.s32.totalorder %s19_s8, %s915_s16  ;;  %p921_p13 = scmp.lt.s32.totalorder %s915_s16, %s915_s16 }
  0x1d   :  { %p922_p0 = por %p921_p13, %p920_p12 }
  0x1f   :  { %p923_p1 = pnand %p922_p0, %p916_p11 }
  0x21   :  { %926 = shalt.err (!%p923_p1)
}
  0x22   :  { %s981_s1 = smov 128   ;;  %s982_s17 = smov 8  }
  0x23   :  { %24 = dma.hbm_to_vmem [thread:$0]  %s1177_s0, 512, %s19_s8, [#allocation3], %s981_s1, %s981_s1, %s982_s17  }
  0x24   :  { %s983_s20 = smov [#allocation7]   ;;  %s927_s24 = scalar_lea.hbm %s1180_s3, 6144 }
  0x25   :  { %s44_s21 = sshll.u32 %s983_s20, 4  ;;  %p928_p2 = scmp.ne.s32.totalorder %s1180_s3, %s927_s24  ;;  %s45_s21 = int_to_ptr.vmem [resolvable:$true] %s44_s21 }
  0x26   :  { %p931_p3 = scmp.lt.u32.totalorder %s927_s24, %s1180_s3 }
  0x28   :  { %p933_p4 = pnand %p931_p3, %p928_p2 }
  0x2a   :  { %936 = shalt.err (!%p933_p4)
}
  0x2b   :  { %s937_s29 = scalar_lea.vmem %s45_s21, 6144  ;;  %p942_p6 = scmp.lt.s32.totalorder %s45_s21, %s45_s21 }
  0x2c   :  { %p938_p5 = scmp.ne.s32.totalorder %s45_s21, %s937_s29  ;;  %p943_p7 = scmp.lt.s32.totalorder %s937_s29, %s937_s29 }
  0x2e   :  { %p944_p8 = por %p943_p7, %p942_p6 }
  0x30   :  { %p945_p9 = pnand %p944_p8, %p938_p5 }
  0x32   :  { %948 = shalt.err (!%p945_p9)
}
  0x33   :  { %50 = dma.hbm_to_vmem [thread:$0]  %s1180_s3, 6144, %s45_s21, [#allocation6], %s981_s1, %s981_s1, %s982_s17  }
  0x34   :  { %971 = dma.done.wait [#allocation3], 512  }
  0x35   :  { %972 = vsyncadd [#allocation3], 4294966784 }
  0x36   :  { %973 = dma.done.wait [#allocation6], 12288  }
  0x37   :  { %974 = vsyncadd [#allocation6], 4294955008  ;;  %v66_v0 = vlaneseq  ;;  %v62_v2 = vld [vmem:[#allocation2] sm:$0xff]  ;;  %v63_v3 = vld [vmem:[#allocation2 + $0x8] sm:$0xff]  ;;  %vm185_vm1 = vcmask 523264   ;;  %s984_s6 = smov 64  }
  0x38   :  { %v64_v4 = vld [vmem:[#allocation2 + $0x10] sm:$0xff]  ;;  %173 = vrot.lane.b32.xlu0 %v62_v2, %s984_s6  ;;  %v143_v5 = vrot.slane %v62_v2, 7  ;;  %v156_v6 = vrot.slane %v62_v2, 1  ;;  %v144_v7 = vrot.slane %v63_v3, 7  ;;  %v157_v8 = vrot.slane %v63_v3, 1  ;;  %v65_v9 = vld [vmem:[#allocation2 + $0x18] sm:$0xff] }
  0x39   :  { %v1059_v1 = vshrl.u32 %v66_v0, 7  ;;  %177 = vrot.lane.b32.xlu1 %v64_v4, %s984_s6  ;;  %v191_v10 = vld [vmem:[#allocation5 + $0x8] sm:$0xff]  ;;  %v158_v11 = vrot.slane %v64_v4, 1  ;;  %v146_v12 = vrot.slane %v65_v9, 7  ;;  %v159_v13 = vrot.slane %v65_v9, 1  ;;  %v193_v14 = vld [vmem:[#allocation5 + $0x18] sm:$0xff] }
  0x3a   :  { %v190_v15 = vld [vmem:[#allocation5] sm:$0xff]  ;;  %v145_v16 = vrot.slane %v64_v4, 7  ;;  %v761_v17 = vpack.c.bf16 %v193_v14, %v191_v10  ;;  %v192_v18 = vld [vmem:[#allocation5 + $0x10] sm:$0xff]  ;;  %v195_v19 = vld [vmem:[#allocation5 + $0x28] sm:$0xff] }
  0x3b   :  { %vm160_vm0 = vcmp.lt.s32.totalorder %v1059_v1, 7  ;;  %vm147_vm2 = vcmp.lt.s32.totalorder %v1059_v1, 1  ;;  %v197_v20 = vld [vmem:[#allocation5 + $0x38] sm:$0xff]  ;;  %v763_v23 = vpack.c.bf16 %v192_v18, %v190_v15  ;;  %v194_v25 = vld [vmem:[#allocation5 + $0x20] sm:$0xff]  ;;  %v196_v26 = vld [vmem:[#allocation5 + $0x30] sm:$0xff] }
  0x3c   :  { %v163_v21 = vsel %vm160_vm0, %v156_v6, %v157_v8  ;;  %v1067_v22 = vsel %vm147_vm2, %v143_v5, %v144_v7  ;;  %v765_v24 = vpack.c.bf16 %v197_v20, %v195_v19  ;;  %v1072_v27 = vsel %vm147_vm2, %v146_v12, %v143_v5  ;;  %175 = vrot.lane.b32.xlu0 %v63_v3, %s984_s6  ;;  %v199_v28 = vld [vmem:[#allocation5 + $0x48] sm:$0xff]  ;;  %v201_v29 = vld [vmem:[#allocation5 + $0x58] sm:$0xff]  ;;  %v198_v35 = vld [vmem:[#allocation5 + $0x40] sm:$0xff] }
  0x3d   :  { %653 = vmatprep.mubr.msk.f32.mxu0 %vm185_vm1, %v163_v21  ;;  %179 = vrot.lane.b32.xlu1 %v65_v9, %s984_s6  ;;  %v1076_v30 = vsel %vm160_vm0, %v157_v8, %v158_v11  ;;  %v1080_v31 = vsel %vm160_vm0, %v158_v11, %v159_v13  ;;  %v767_v32 = vpack.c.bf16 %v196_v26, %v194_v25  ;;  %v200_v36 = vld [vmem:[#allocation5 + $0x50] sm:$0xff]  ;;  %v203_v37 = vld [vmem:[#allocation5 + $0x68] sm:$0xff]  ;;  %v205_v38 = vld [vmem:[#allocation5 + $0x78] sm:$0xff] }
  0x3e   :  { %762 = vmatprep.subr.bf16.mxu0 %v761_v17  ;;  %v1084_v33 = vsel %vm147_vm2, %v144_v7, %v145_v16  ;;  %v769_v34 = vpack.c.bf16 %v201_v29, %v199_v28  ;;  %v1088_v39 = vsel %vm160_vm0, %v159_v13, %v156_v6  ;;  %v1092_v40 = vsel %vm147_vm2, %v145_v16, %v146_v12  ;;  %v202_v43 = vld [vmem:[#allocation5 + $0x60] sm:$0xff]  ;;  %v204_v44 = vld [vmem:[#allocation5 + $0x70] sm:$0xff]  ;;  %v207_v45 = vld [vmem:[#allocation5 + $0x88] sm:$0xff] }
  0x3f   :  { %764 = vmatpush1.bf16.msra.mxu0 %v763_v23  ;;  %v771_v41 = vpack.c.bf16 %v200_v36, %v198_v35  ;;  %v773_v42 = vpack.c.bf16 %v205_v38, %v203_v37  ;;  %v209_v46 = vld [vmem:[#allocation5 + $0x98] sm:$0xff]  ;;  %v775_v47 = vpack.c.bf16 %v204_v44, %v202_v43  ;;  %v206_v49 = vld [vmem:[#allocation5 + $0x80] sm:$0xff]  ;;  %v208_v50 = vld [vmem:[#allocation5 + $0x90] sm:$0xff] }
  0x40   :  { %766 = vmatprep.subr.bf16.mxu0 %v765_v24  ;;  %v777_v48 = vpack.c.bf16 %v209_v46, %v207_v45  ;;  %v211_v51 = vld [vmem:[#allocation5 + $0xa8] sm:$0xff]  ;;  %v213_v52 = vld [vmem:[#allocation5 + $0xb8] sm:$0xff]  ;;  %v210_v53 = vld [vmem:[#allocation5 + $0xa0] sm:$0xff]  ;;  %v779_v58 = vpack.c.bf16 %v208_v50, %v206_v49 }
  0x41   :  { %v212_v54 = vld [vmem:[#allocation5 + $0xb0] sm:$0xff]  ;;  %v402_v55 = vld [vmem:[#allocation7 + $0x80] sm:$0xff]  ;;  %v403_v56 = vld [vmem:[#allocation7 + $0x88] sm:$0xff]  ;;  %v781_v63 = vpack.c.bf16 %v213_v52, %v211_v51 }
  0x42   :  { %v386_v57 = vld [vmem:[#allocation7] sm:$0xff]  ;;  %v809_v59 = vpack.c.bf16 %v403_v56, %v402_v55  ;;  %v387_v60 = vld [vmem:[#allocation7 + $0x8] sm:$0xff]  ;;  %v404_v61 = vld [vmem:[#allocation7 + $0x90] sm:$0xff]  ;;  %v783_v10 = vpack.c.bf16 %v212_v54, %v210_v53  ;;  %v68_v56 = vadd.s32 8, %v1059_v1 }
  0x43   :  { %768 = vmatpush1.bf16.msra.mxu0 %v767_v32  ;;  %v405_v62 = vld [vmem:[#allocation7 + $0x98] sm:$0xff]  ;;  %v811_v0 = vpack.c.bf16 %v387_v60, %v386_v57  ;;  %v388_v3 = vld [vmem:[#allocation7 + $0x10] sm:$0xff]  ;;  %v406_v5 = vld [vmem:[#allocation7 + $0xa0] sm:$0xff]  ;;  %v75_v57 = vand.u32 15, %v1059_v1 }
  0x44   :  { %770 = vmatprep.subr.bf16.mxu0 %v769_v34  ;;  %v813_v2 = vpack.c.bf16 %v405_v62, %v404_v61  ;;  %v389_v4 = vld [vmem:[#allocation7 + $0x18] sm:$0xff]  ;;  %v215_v6 = vld [vmem:[#allocation5 + $0xc8] sm:$0xff]  ;;  %810 = vmatprep.subr.bf16.mxu1 %v809_v59  ;;  %v390_v12 = vld [vmem:[#allocation7 + $0x20] sm:$0xff]  ;;  %v69_v59 = vadd.s32 16, %v1059_v1  ;;  %v70_v61 = vadd.s32 24, %v1059_v1  ;;  %v985_v62 = vmov 0.0  }
  0x45   :  { %v217_v7 = vld [vmem:[#allocation5 + $0xd8] sm:$0xff]  ;;  %v407_v8 = vld [vmem:[#allocation7 + $0xa8] sm:$0xff]  ;;  %812 = vmatpush3.bf16.msra.mxu1 %v811_v0  ;;  %v815_v9 = vpack.c.bf16 %v389_v4, %v388_v3  ;;  %v214_v15 = vld [vmem:[#allocation5 + $0xc0] sm:$0xff]  ;;  %vm119_vm3 = vcmp.ne.s32.totalorder %v75_v57, 0 }
  0x46   :  { %814 = vmatprep.subr.bf16.mxu1 %v813_v2  ;;  %v817_v11 = vpack.c.bf16 %v407_v8, %v406_v5  ;;  %v391_v13 = vld [vmem:[#allocation7 + $0x28] sm:$0xff]  ;;  %v785_v14 = vpack.c.bf16 %v217_v7, %v215_v6  ;;  %v216_v16 = vld [vmem:[#allocation5 + $0xd0] sm:$0xff]  ;;  %v221_v18 = vld [vmem:[#allocation5 + $0xf8] sm:$0xff]  ;;  %v89_v60 = vand.u32 15, %v69_v59  ;;  %v96_v3 = vand.u32 15, %v70_v61 }
  0x47   :  { %772 = vmatpush1.bf16.msra.mxu0 %v771_v41  ;;  %v219_v17 = vld [vmem:[#allocation5 + $0xe8] sm:$0xff]  ;;  %v819_v19 = vpack.c.bf16 %v391_v13, %v390_v12  ;;  %v787_v20 = vpack.c.bf16 %v216_v16, %v214_v15  ;;  %v218_v23 = vld [vmem:[#allocation5 + $0xe0] sm:$0xff]  ;;  %v220_v24 = vld [vmem:[#allocation5 + $0xf0] sm:$0xff] }
  0x48   :  { %774 = vmatprep.subr.bf16.mxu0 %v773_v42  ;;  %v789_v21 = vpack.c.bf16 %v221_v18, %v219_v17  ;;  %v223_v25 = vld [vmem:[#allocation5 + $0x108] sm:$0xff]  ;;  %v225_v26 = vld [vmem:[#allocation5 + $0x118] sm:$0xff]  ;;  %v791_v28 = vpack.c.bf16 %v220_v24, %v218_v23  ;;  %v222_v32 = vld [vmem:[#allocation5 + $0x100] sm:$0xff]  ;;  %vm121_vm5 = vcmp.ne.s32.totalorder %v89_v60, 0  ;;  %vm134_vm6 = vcmp.ne.s32.totalorder %v96_v3, 15 }
  0x49   :  { %816 = vmatpush3.bf16.msra.mxu1 %v815_v9  ;;  %v793_v29 = vpack.c.bf16 %v225_v26, %v223_v25  ;;  %v224_v34 = vld [vmem:[#allocation5 + $0x110] sm:$0xff]  ;;  %v227_v35 = vld [vmem:[#allocation5 + $0x128] sm:$0xff]  ;;  %v229_v36 = vld [vmem:[#allocation5 + $0x138] sm:$0xff]  ;;  %v1106_v6 = vsel %vm121_vm5, 1.0, %v985_v62 }
  0x4a   :  { %818 = vmatprep.subr.bf16.mxu1 %v817_v11  ;;  %v795_v37 = vpack.c.bf16 %v224_v34, %v222_v32  ;;  %v797_v38 = vpack.c.bf16 %v229_v36, %v227_v35  ;;  %v226_v41 = vld [vmem:[#allocation5 + $0x120] sm:$0xff]  ;;  %v228_v42 = vld [vmem:[#allocation5 + $0x130] sm:$0xff]  ;;  %v231_v43 = vld [vmem:[#allocation5 + $0x148] sm:$0xff]  ;;  %v154_v9 = vmul.f32 %v1106_v6, %v1084_v33 }
  0x4b   :  { %776 = vmatpush1.bf16.msra.mxu0 %v775_v47  ;;  %v233_v44 = vld [vmem:[#allocation5 + $0x158] sm:$0xff]  ;;  %v799_v45 = vpack.c.bf16 %v228_v42, %v226_v41  ;;  %v230_v47 = vld [vmem:[#allocation5 + $0x140] sm:$0xff]  ;;  %v235_v49 = vld [vmem:[#allocation5 + $0x168] sm:$0xff] }
  0x4c   :  { %778 = vmatprep.subr.bf16.mxu0 %v777_v48  ;;  %v801_v46 = vpack.c.bf16 %v233_v44, %v231_v43  ;;  %v232_v48 = vld [vmem:[#allocation5 + $0x150] sm:$0xff]  ;;  %v237_v50 = vld [vmem:[#allocation5 + $0x178] sm:$0xff]  ;;  %v234_v53 = vld [vmem:[#allocation5 + $0x160] sm:$0xff] }
  0x4d   :  { %820 = vmatpush3.bf16.msra.mxu1 %v819_v19  ;;  %v803_v51 = vpack.c.bf16 %v232_v48, %v230_v47  ;;  %v805_v52 = vpack.c.bf16 %v237_v50, %v235_v49  ;;  %v236_v54 = vld [vmem:[#allocation5 + $0x170] sm:$0xff]  ;;  %v409_v15 = vld [vmem:[#allocation7 + $0xb8] sm:$0xff]  ;;  %v411_v19 = vld [vmem:[#allocation7 + $0xc8] sm:$0xff] }
  0x4e   :  { %v807_v55 = vpack.c.bf16 %v236_v54, %v234_v53  ;;  %v392_v16 = vld [vmem:[#allocation7 + $0x30] sm:$0xff]  ;;  %v393_v17 = vld [vmem:[#allocation7 + $0x38] sm:$0xff]  ;;  %v414_v32 = vld [vmem:[#allocation7 + $0xe0] sm:$0xff] }
  0x4f   :  { %780 = vmatpush1.bf16.msra.mxu0 %v779_v58  ;;  %v82_v58 = vand.u32 15, %v68_v56  ;;  %v823_v18 = vpack.c.bf16 %v393_v17, %v392_v16  ;;  %v412_v24 = vld [vmem:[#allocation7 + $0xd0] sm:$0xff]  ;;  %v413_v25 = vld [vmem:[#allocation7 + $0xd8] sm:$0xff]  ;;  %v415_v34 = vld [vmem:[#allocation7 + $0xe8] sm:$0xff] }
  0x50   :  { %782 = vmatprep.subr.bf16.mxu0 %v781_v63  ;;  %v1098_v63 = vsel %vm119_vm3, 1.0, %v985_v62  ;;  %v396_v26 = vld [vmem:[#allocation7 + $0x50] sm:$0xff]  ;;  %v833_v35 = vpack.c.bf16 %v415_v34, %v414_v32  ;;  %v398_v36 = vld [vmem:[#allocation7 + $0x60] sm:$0xff]  ;;  %v417_v42 = vld [vmem:[#allocation7 + $0xf8] sm:$0xff] }
  0x51   :  { %vm132_vm4 = vcmp.ne.s32.totalorder %v82_v58, 15  ;;  %v152_v2 = vmul.f32 %v1098_v63, %v1072_v27  ;;  %v1112_v27 = vsel %vm134_vm6, 1.0, %v985_v62  ;;  %v416_v41 = vld [vmem:[#allocation7 + $0xf0] sm:$0xff]  ;;  %v418_v47 = vld [vmem:[#allocation7 + $0x100] sm:$0xff]  ;;  %v419_v48 = vld [vmem:[#allocation7 + $0x108] sm:$0xff] }
  0x52   :  { %v1100_v0 = vsel %vm132_vm4, 1.0, %v985_v62  ;;  %v168_v12 = vmul.f32 %v1112_v27, %v1088_v39  ;;  %v394_v39 = vld [vmem:[#allocation7 + $0x40] sm:$0xff]  ;;  %v837_v43 = vpack.c.bf16 %v417_v42, %v416_v41  ;;  %v400_v44 = vld [vmem:[#allocation7 + $0x70] sm:$0xff]  ;;  %v841_v49 = vpack.c.bf16 %v419_v48, %v418_v47  ;;  %v425_v34 = vld [vmem:[#allocation7 + $0x138] sm:$0xff] }
  0x53   :  { %784 = vmatpush1.bf16.msra.mxu0 %v783_v10  ;;  %v166_v4 = vmul.f32 %v1100_v0, %v1076_v30  ;;  %v657_v50 = vld [vmem:[%s1179_s2] ss:$0 sm:$0xff]  ;;  %v424_v32 = vld [vmem:[#allocation7 + $0x130] sm:$0xff]  ;;  %v429_v41 = vld [vmem:[#allocation7 + $0x158] sm:$0xff] }
  0x54   :  { %786 = vmatprep.subr.bf16.mxu0 %v785_v14  ;;  %v408_v14 = vld [vmem:[#allocation7 + $0xb0] sm:$0xff]  ;;  %v853_v1 = vpack.c.bf16 %v425_v34, %v424_v32 }
  0x57   :  { %788 = vmatpush1.bf16.msra.mxu0 %v787_v20 }
  0x58   :  { %790 = vmatprep.subr.bf16.mxu0 %v789_v21  ;;  %v395_v21 = vld [vmem:[#allocation7 + $0x48] sm:$0xff] }
  0x59   :  { %v827_v23 = vpack.c.bf16 %v395_v21, %v394_v39 }
  0x5b   :  { %792 = vmatpush1.bf16.msra.mxu0 %v791_v28  ;;  %v397_v28 = vld [vmem:[#allocation7 + $0x58] sm:$0xff] }
  0x5c   :  { %794 = vmatprep.subr.bf16.mxu0 %v793_v29  ;;  %v831_v29 = vpack.c.bf16 %v397_v28, %v396_v26  ;;  %v422_v26 = vld [vmem:[#allocation7 + $0x120] sm:$0xff]  ;;  %v423_v28 = vld [vmem:[#allocation7 + $0x128] sm:$0xff] }
  0x5f   :  { %796 = vmatpush1.bf16.msra.mxu0 %v795_v37  ;;  %v399_v37 = vld [vmem:[#allocation7 + $0x68] sm:$0xff] }
  0x60   :  { %798 = vmatprep.subr.bf16.mxu0 %v797_v38  ;;  %v835_v38 = vpack.c.bf16 %v399_v37, %v398_v36  ;;  %v426_v36 = vld [vmem:[#allocation7 + $0x140] sm:$0xff]  ;;  %v427_v37 = vld [vmem:[#allocation7 + $0x148] sm:$0xff] }
  0x63   :  { %800 = vmatpush1.bf16.msra.mxu0 %v799_v45  ;;  %v401_v45 = vld [vmem:[#allocation7 + $0x78] sm:$0xff] }
  0x64   :  { %802 = vmatprep.subr.bf16.mxu0 %v801_v46  ;;  %v839_v46 = vpack.c.bf16 %v401_v45, %v400_v44  ;;  %v431_v44 = vld [vmem:[#allocation7 + $0x168] sm:$0xff]  ;;  %v432_v45 = vld [vmem:[#allocation7 + $0x170] sm:$0xff] }
  0x67   :  { %804 = vmatpush1.bf16.msra.mxu0 %v803_v51 }
  0x68   :  { %806 = vmatprep.subr.bf16.mxu0 %v805_v52 }
  0x6b   :  { %808 = vmatpush1.bf16.msra.mxu0 %v807_v55 }
  0xaa   :  { %v174_v5 = vpop.permute.xlu0 %173 }
  0xab   :  { %v186_v7 = vsel %vm185_vm1, %v152_v2, %v174_v5  ;;  %v178_v8 = vpop.permute.xlu1 %177 }
  0xac   :  { %315 = vmatmul.mubr.f32.vlgmr.msra.gmra.mrb[0].mxu0 %v186_v7  ;;  %v188_v30 = vsel %vm185_vm1, %v154_v9, %v178_v8 }
  0xad   :  { %654 = vmatprep.mubr.msk.f32.mxu0 %vm185_vm1, %v166_v4 }
  0xae   :  { %v176_v10 = vpop.permute.xlu0 %175 }
  0xaf   :  { %v187_v11 = vsel %vm185_vm1, %v1067_v22, %v176_v10  ;;  %v180_v13 = vpop.permute.xlu1 %179  ;;  %v821_v22 = vpack.c.bf16 %v409_v15, %v408_v14 }
  0xb0   :  { %321 = vmatmul.mubr.f32.gmra.mrb[2].mxu0 %v187_v11  ;;  %v189_v33 = vsel %vm185_vm1, %v1092_v40, %v180_v13  ;;  %v829_v40 = vpack.c.bf16 %v413_v25, %v412_v24 }
  0xb1   :  { %655 = vmatprep.mubr.msk.f32.mxu0 %vm185_vm1, %v1080_v31  ;;  %822 = vmatprep.subr.bf16.mxu1 %v821_v22  ;;  %v410_v31 = vld [vmem:[#allocation7 + $0xc0] sm:$0xff] }
  0xb2   :  { %824 = vmatpush3.bf16.msra.mxu1 %v823_v18  ;;  %v825_v20 = vpack.c.bf16 %v411_v19, %v410_v31  ;;  %v420_v31 = vld [vmem:[#allocation7 + $0x110] sm:$0xff]  ;;  %v421_v19 = vld [vmem:[#allocation7 + $0x118] sm:$0xff] }
  0xb4   :  { %327 = vmatmul.mubr.f32.gmra.mrb[4].mxu0 %v188_v30  ;;  %826 = vmatprep.subr.bf16.mxu1 %v825_v20 }
  0xb5   :  { %656 = vmatprep.mubr.msk.f32.mxu0 %vm185_vm1, %v168_v12 }
  0xb6   :  { %828 = vmatpush3.bf16.msra.mxu1 %v827_v23 }
  0xb7   :  { %830 = vmatprep.subr.bf16.mxu1 %v829_v40  ;;  %v845_v40 = vpack.c.bf16 %v421_v19, %v420_v31 }
  0xb8   :  { %333 = vmatmul.mubr.f32.gmra.mrb[6].mxu0 %v189_v33 }
  0xba   :  { %832 = vmatpush3.bf16.msra.mxu1 %v831_v29  ;;  %v849_v29 = vpack.c.bf16 %v423_v28, %v422_v26 }
  0xbb   :  { %834 = vmatprep.subr.bf16.mxu1 %v833_v35 }
  0xbe   :  { %836 = vmatpush3.bf16.msra.mxu1 %v835_v38  ;;  %v428_v38 = vld [vmem:[#allocation7 + $0x150] sm:$0xff] }
  0xbf   :  { %838 = vmatprep.subr.bf16.mxu1 %v837_v43  ;;  %v861_v42 = vpack.c.bf16 %v429_v41, %v428_v38  ;;  %v430_v43 = vld [vmem:[#allocation7 + $0x160] sm:$0xff] }
  0xc2   :  { %840 = vmatpush3.bf16.msra.mxu1 %v839_v46  ;;  %v433_v46 = vld [vmem:[#allocation7 + $0x178] sm:$0xff] }
  0xc3   :  { %842 = vmatprep.subr.bf16.mxu1 %v841_v49  ;;  %v869_v47 = vpack.c.bf16 %v433_v46, %v432_v45 }
 0x17f   :  { %v316_v51 = vpop.f32.mrb[0].mxu0 }
 0x180   :  { %v346_v52 = vadd.f32 %v657_v50, %v316_v51  ;;  %v1127_v53 = vpop.f32.mrb[1].mxu0 }
 0x182   :  { %v354_v54 = vmul.f32 0.2, %v346_v52  ;;  %vm350_vm7 = vcmp.gt.f32.partialorder %v346_v52, 0.0 }
 0x183   :  { %v322_v55 = vpop.f32.mrb[2].mxu0 }
 0x184   :  { %v347_v56 = vadd.f32 %v657_v50, %v322_v55  ;;  %v1129_v57 = vpop.f32.mrb[3].mxu0  ;;  %v358_v58 = vsel %vm350_vm7, %v346_v52, %v354_v54 }
 0x185   :  { %505 = vmatprep.mubr.f32.mxu1 %v358_v58  ;;  %v362_v3 = vrot.slane %v358_v58, 7  ;;  %v374_v4 = vrot.slane %v358_v58, 1 }
 0x186   :  { %v355_v59 = vmul.f32 0.2, %v347_v56  ;;  %vm351_vm8 = vcmp.gt.f32.partialorder %v347_v56, 0.0 }
 0x187   :  { %v328_v60 = vpop.f32.mrb[4].mxu0 }
 0x188   :  { %v348_v61 = vadd.f32 %v657_v50, %v328_v60  ;;  %v1131_v62 = vpop.f32.mrb[5].mxu0  ;;  %v359_v2 = vsel %vm351_vm8, %v347_v56, %v355_v59 }
 0x189   :  { %v363_v5 = vrot.slane %v359_v2, 7  ;;  %v375_v7 = vrot.slane %v359_v2, 1 }
 0x18a   :  { %v356_v8 = vmul.f32 0.2, %v348_v61  ;;  %vm352_vm9 = vcmp.gt.f32.partialorder %v348_v61, 0.0 }
 0x18b   :  { %v334_v9 = vpop.f32.mrb[6].mxu0  ;;  %v368_v10 = vsel %vm147_vm2, %v362_v3, %v363_v5  ;;  %v380_v11 = vsel %vm160_vm0, %v374_v4, %v375_v7 }
 0x18c   :  { %v349_v30 = vadd.f32 %v657_v50, %v334_v9  ;;  %v1137_v12 = vpop.f32.mrb[7].mxu0  ;;  %v360_v13 = vsel %vm352_vm9, %v348_v61, %v356_v8 }
 0x18d   :  { %v364_v33 = vrot.slane %v360_v13, 7  ;;  %v376_v14 = vrot.slane %v360_v13, 1 }
 0x18e   :  { %vm353_vm10 = vcmp.gt.f32.partialorder %v349_v30, 0.0  ;;  %v357_v15 = vmul.f32 0.2, %v349_v30 }
 0x18f   :  { %v379_v22 = vsel %vm160_vm0, %v375_v7, %v376_v14  ;;  %v367_v16 = vsel %vm147_vm2, %v363_v5, %v364_v33 }
 0x190   :  { %v361_v17 = vsel %vm353_vm10, %v349_v30, %v357_v15  ;;  %v372_v35 = vmul.f32 %v1106_v6, %v367_v16  ;;  %v865_v6 = vpack.c.bf16 %v431_v44, %v430_v43  ;;  %v383_v48 = vmul.f32 %v1100_v0, %v379_v22  ;;  %v658_v0 = vld [vmem:[%s1181_s4] ss:$0 sm:$0xff]  ;;  %s986_s4 = smov [#allocation8]  }
 0x191   :  { %v365_v18 = vrot.slane %v361_v17, 7  ;;  %v377_v20 = vrot.slane %v361_v17, 1  ;;  %s636_s9 = sshll.u32 %s986_s4, 4  ;;  %s637_s9 = int_to_ptr.vmem [resolvable:$true] %s636_s9 }
 0x192   :  { %s949_s10 = scalar_lea.vmem %s637_s9, 512  ;;  %p954_p11 = scmp.lt.s32.totalorder %s637_s9, %s637_s9 }
 0x193   :  { %v369_v39 = vsel %vm147_vm2, %v365_v18, %v362_v3  ;;  %v366_v21 = vsel %vm147_vm2, %v364_v33, %v365_v18  ;;  %v378_v23 = vsel %vm160_vm0, %v376_v14, %v377_v20  ;;  %v381_v24 = vsel %vm160_vm0, %v377_v20, %v374_v4  ;;  %p950_p10 = scmp.ne.s32.totalorder %s637_s9, %s949_s10  ;;  %p955_p12 = scmp.lt.s32.totalorder %s949_s10, %s949_s10 }
 0x194   :  { %v370_v25 = vmul.f32 %v1098_v63, %v369_v39  ;;  %v857_v63 = vpack.c.bf16 %v427_v37, %v426_v36 }
 0x195   :  { %p956_p13 = por %p955_p12, %p954_p11 }
 0x196   :  { %506 = vmatmul.mubr.f32.vlgmr.msra.gmra.mrb[0].mxu1 %v370_v25 }
 0x197   :  { %844 = vmatpush3.bf16.msra.mxu1 %v841_v49  ;;  %510 = vmatprep.mubr.f32.mxu1 %v359_v2  ;;  %v385_v49 = vmul.f32 %v1112_v27, %v381_v24  ;;  %p957_p0 = pnand %p956_p13, %p950_p10 }
 0x198   :  { %846 = vmatprep.subr.bf16.mxu1 %v845_v40 }
 0x19a   :  { %511 = vmatmul.mubr.f32.gmra.mrb[2].mxu1 %v368_v10 }
 0x19b   :  { %848 = vmatpush3.bf16.msra.mxu1 %v845_v40  ;;  %515 = vmatprep.mubr.f32.mxu1 %v360_v13 }
 0x19c   :  { %850 = vmatprep.subr.bf16.mxu1 %v849_v29 }
 0x19e   :  { %516 = vmatmul.mubr.f32.gmra.mrb[4].mxu1 %v372_v35 }
 0x19f   :  { %852 = vmatpush3.bf16.msra.mxu1 %v849_v29  ;;  %520 = vmatprep.mubr.f32.mxu1 %v361_v17 }
 0x1a0   :  { %854 = vmatprep.subr.bf16.mxu1 %v853_v1 }
 0x1a2   :  { %521 = vmatmul.mubr.f32.gmra.mrb[6].mxu1 %v366_v21 }
 0x1a3   :  { %856 = vmatpush3.bf16.msra.mxu1 %v853_v1  ;;  %755 = vmatprep.mubr.f32.mxu1 %v380_v11 }
 0x1a4   :  { %858 = vmatprep.subr.bf16.mxu1 %v857_v63 }
 0x1a7   :  { %860 = vmatpush3.bf16.msra.mxu1 %v857_v63 }
 0x1a8   :  { %862 = vmatprep.subr.bf16.mxu1 %v861_v42 }
 0x1ab   :  { %864 = vmatpush3.bf16.msra.mxu1 %v861_v42 }
 0x1ac   :  { %866 = vmatprep.subr.bf16.mxu1 %v865_v6 }
 0x1af   :  { %868 = vmatpush3.bf16.msra.mxu1 %v865_v6 }
 0x1b0   :  { %870 = vmatprep.subr.bf16.mxu1 %v869_v47 }
 0x1b3   :  { %872 = vmatpush3.bf16.msra.mxu1 %v869_v47 }
 0x1b6   :  { %756 = vmatmul.mubr.f32.vlgmr.msra.gmra.mrb[8].mxu1 %v383_v48 }
 0x1b7   :  { %758 = vmatprep.mubr.f32.mxu1 %v378_v23 }
 0x1ba   :  { %759 = vmatmul.mubr.f32.gmra.mrb[10].mxu1 %v385_v49 }
 0x269   :  { %v691_v50 = vpop.f32.mrb[0].mxu1 }
 0x26a   :  { %v692_v51 = vpop.f32.mrb[1].mxu1 }
 0x26b   :  { %v693_v52 = vadd.f32 %v692_v51, %v691_v50 }
 0x26d   :  { %v694_v54 = vpop.f32.mrb[2].mxu1  ;;  %v508_v27 = vadd.f32 %v693_v52, %v658_v0 }
 0x26e   :  { %v695_v55 = vpop.f32.mrb[3].mxu1 }
 0x26f   :  { %v696_v56 = vadd.f32 %v695_v55, %v694_v54 }
 0x271   :  { %v697_v58 = vpop.f32.mrb[4].mxu1  ;;  %v513_v4 = vadd.f32 %v696_v56, %v658_v0 }
 0x272   :  { %v698_v59 = vpop.f32.mrb[5].mxu1 }
 0x273   :  { %v699_v60 = vadd.f32 %v698_v59, %v697_v58 }
 0x275   :  { %v700_v61 = vpop.f32.mrb[6].mxu1  ;;  %v518_v33 = vadd.f32 %v699_v60, %v658_v0 }
 0x276   :  { %v701_v2 = vpop.f32.mrb[7].mxu1 }
 0x277   :  { %v702_v3 = vadd.f32 %v701_v2, %v700_v61 }
 0x279   :  { %v523_v11 = vadd.f32 %v702_v3, %v658_v0 }
 0x289   :  { %v757_v5 = vpop.f32.mrb[8].mxu1 }
 0x28a   :  { %v598_v7 = vadd.f32 %v757_v5, %v513_v4  ;;  %v592_v8 = vpop.f32.mrb[9].mxu1 }
 0x28b   :  { %v593_v9 = vadd.f32 %v592_v8, %v508_v27 }
 0x28c   :  { %v612_v10 = vadd.f32 %v598_v7, %v1129_v57 }
 0x28d   :  { %v611_v30 = vadd.f32 %v593_v9, %v1127_v53  ;;  %v760_v13 = vpop.f32.mrb[10].mxu1 }
 0x28e   :  { %vm616_vm11 = vcmp.gt.f32.partialorder %v612_v10, 0.0  ;;  %v620_v14 = vmul.f32 0.2, %v612_v10  ;;  %v608_v15 = vadd.f32 %v760_v13, %v523_v11  ;;  %v602_v22 = vpop.f32.mrb[11].mxu1 }
 0x28f   :  { %vm615_vm12 = vcmp.gt.f32.partialorder %v611_v30, 0.0  ;;  %v619_v16 = vmul.f32 0.2, %v611_v30  ;;  %v603_v17 = vadd.f32 %v602_v22, %v518_v33 }
 0x290   :  { %v624_v18 = vsel %vm616_vm11, %v612_v10, %v620_v14  ;;  %v614_v31 = vadd.f32 %v608_v15, %v1137_v12 }
 0x291   :  { %628 = vst [vmem:[#allocation8 + $0x8] sm:$0xff] %v624_v18  ;;  %v623_v19 = vsel %vm615_vm12, %v611_v30, %v619_v16  ;;  %v613_v20 = vadd.f32 %v603_v17, %v1131_v62 }
 0x292   :  { %627 = vst [vmem:[#allocation8] sm:$0xff] %v623_v19  ;;  %vm618_vm13 = vcmp.gt.f32.partialorder %v614_v31, 0.0  ;;  %v622_v53 = vmul.f32 0.2, %v614_v31 }
 0x293   :  { %vm617_vm14 = vcmp.gt.f32.partialorder %v613_v20, 0.0  ;;  %v621_v57 = vmul.f32 0.2, %v613_v20 }
 0x294   :  { %v626_v39 = vsel %vm618_vm13, %v614_v31, %v622_v53 }
 0x295   :  { %630 = vst [vmem:[#allocation8 + $0x18] sm:$0xff] %v626_v39  ;;  %v625_v21 = vsel %vm617_vm14, %v613_v20, %v621_v57 }
 0x296   :  { %629 = vst [vmem:[#allocation8 + $0x10] sm:$0xff] %v625_v21 }
 0x297   :  { %960 = shalt.err (!%p957_p0)
}
 0x298   :  { %s961_s13 = scalar_lea.hbm %s1182_s5, 512 }
 0x299   :  { %p962_p1 = scmp.ne.s32.totalorder %s1182_s5, %s961_s13  ;;  %p965_p2 = scmp.lt.u32.totalorder %s961_s13, %s1182_s5 }
 0x29b   :  { %p967_p3 = pnand %p965_p2, %p962_p1 }
 0x29d   :  { %970 = shalt.err (!%p967_p3)
}
 0x29e   :  { %642 = dma.vmem_to_hbm [thread:$0]  %s637_s9, 512, %s1182_s5, [#allocation4], %s981_s1, %s981_s1, %s982_s17  }
 0x29f   :  { %975 = dma.done.wait [#allocation4], 512  }
 0x2a0   :  { %976 = vsyncadd [#allocation4], 4294966784 }
 0x2a1   :  { %646 = vsyncpa [#allocation3], 1 }
 0x2a2   :  { %647 = vsyncpa [#allocation6], 1 }
 0x2a3   :  { %648 = vsyncpa [#allocation4], 1 }

</bundles_post_ra>
